<compile_context>
chip_gen: v7x
topology: tpu7x:2x2x1
jax: 0.10.0
libtpu: 0.0.40
codegen_flags: <defaults>
</compile_context>

<pallas_src>
import functools

import jax
import jax.numpy as jnp
from jax.experimental import pallas as pl
from jax.experimental.pallas import tpu as pltpu

LANES = 128


def _pair(v):
    if isinstance(v, (tuple, list)):
        assert len(v) == 2
        return int(v[0]), int(v[1])
    return int(v), int(v)


def _pool_out_size(size, k, s, p, d, ceil_mode):
    """Output size formula matching torch.nn.functional.max_pool2d."""
    eff_k = d * (k - 1) + 1
    num = size + 2 * p - eff_k
    if ceil_mode:
        out = -(-num // s) + 1
        # torch: the last window must start inside the input (or left padding)
        if (out - 1) * s >= size + p:
            out -= 1
    else:
        out = num // s + 1
    return out


def _win(start, size, stride):
    """(Possibly strided) window along a Ref dimension."""
    if stride == 1:
        return pl.ds(start, size)
    return pl.ds(start, size, stride=stride)


def _vmem_capacity_bytes():
    try:
        return int(pltpu.get_tpu_info().vmem_capacity_bytes)
    except Exception:
        return 64 * 1024 * 1024  # conservative fallback: v7x per-TC VMEM


def _make_kernel(*, kh, kw, sh, sw, dh, dw, ph, pw, needs_pad, w_span, pad_val):
    def kernel(x_ref, o_ref, *scratch):
        si = 0
        if needs_pad:
            pad_ref = scratch[si]
            si += 1
        if sw > 1:
            row_ref = scratch[si]
            si += 1

        h_blk, wout, _ = o_ref.shape

        if needs_pad:
            # In-kernel border handling: fill with -inf / int-min, then drop the
            # raw input block at offset (ph, pw).  Replaces the old wrapper-side
            # jnp.pad (which cost an extra HBM read+write of the whole input).
            pad_ref[...] = jnp.full(pad_ref.shape, pad_val, pad_ref.dtype)
            hin, win, _ = x_ref.shape
            pad_ref[pl.ds(ph, hin), pl.ds(pw, win), :] = x_ref[...]
            src = pad_ref
        else:
            src = x_ref

        # kh x kw taps, accumulated in the input dtype (no f32 widening).
        # H sits on an outer (non-tiled) dim, so strided starts there are pure
        # addressing; W taps are contiguous stride-1 slices of width w_span.
        acc = None
        for ih in range(kh):
            h_win = _win(ih * dh, h_blk, sh)
            for iw in range(kw):
                tap = src[h_win, pl.ds(iw * dw, w_span), :]
                acc = tap if acc is None else jnp.maximum(acc, tap)
        # TODO(synk): for very large kernel_size switch the static tap unroll
        # to lax.fori_loop(..., unroll=True) to bound code size.

        if sw == 1:
            o_ref[...] = acc
        else:
            # Single strided downsample instead of kh*kw strided sublane reads.
            row_ref[...] = acc
            o_ref[...] = row_ref[:, _win(0, wout, sw), :]

    return kernel


def pallas_max_pool2d(x, kernel_size, stride=None, padding=0, dilation=1,
                      ceil_mode=False):
    """max_pool2d for NCHW input, matching torch.nn.functional.max_pool2d."""
    assert x.ndim == 4, "expected NCHW input"
    kh, kw = _pair(kernel_size)
    sh, sw = _pair(kernel_size if stride is None else stride)
    ph, pw = _pair(padding)
    dh, dw = _pair(dilation)

    n, c, h, w = x.shape
    hout = _pool_out_size(h, kh, sh, ph, dh, ceil_mode)
    wout = _pool_out_size(w, kw, sw, pw, dw, ceil_mode)
    eff_kh = dh * (kh - 1) + 1
    eff_kw = dw * (kw - 1) + 1

    # Rows/cols the pooling actually reads (incl. ceil_mode overhang).
    h_need = (hout - 1) * sh + eff_kh
    w_need = (wout - 1) * sw + eff_kw
    pad_h_hi = max(h_need - h - ph, 0)
    pad_w_hi = max(w_need - w - pw, 0)
    needs_pad = bool(ph or pw or pad_h_hi or pad_w_hi)
    h_tot = h + ph + pad_h_hi
    w_tot = w + pw + pad_w_hi
    w_span = (wout - 1) * sw + 1          # width of the pre-downsample row max

    if jnp.issubdtype(x.dtype, jnp.floating):
        pad_val = float("-inf")           # torch pads max_pool with -inf, not 0
    else:
        pad_val = int(jnp.iinfo(x.dtype).min)

    nc = n * c
    itemsize = jnp.dtype(x.dtype).itemsize

    # Lane-dense layout: batch*channels on the 128-lane axis.  Pad N*C up to a
    # multiple of 128 (unmasked stores, dense DMA) unless that would inflate
    # HBM traffic by more than 2x (tiny N*C like the unit test).
    nc_pad = -(-nc // LANES) * LANES
    if nc % LANES != 0 and nc_pad > 2 * nc:
        nc_pad = nc

    # ---- per-generation VMEM budgeting -------------------------------------
    vmem_cap = _vmem_capacity_bytes()            # 128 MiB v5e/v6e, 64 MiB v7x
    vmem_limit = min(vmem_cap * 3 // 4, 96 * 1024 * 1024)
    budget = vmem_limit - 4 * 1024 * 1024        # headroom

    def step_bytes(c_blk, h_blk_out, in_rows):
        b = 2 * (in_rows * w + h_blk_out * wout) * c_blk * itemsize  # dbl-buffered
        if needs_pad:
            b += h_tot * w_tot * c_blk * itemsize
        if sw > 1:
            b += h_blk_out * w_span * c_blk * itemsize
        return b

    c_blk = LANES if nc_pad % LANES == 0 else nc_pad

    # H tiling only when row windows do not overlap (sh >= eff_kh) and no border
    # padding is needed (covers the dominant k2s2 / k3s3 cases).
    h_tilable = (not needs_pad) and (sh >= eff_kh) and hout >= 2
    h_blk_out = hout
    if h_tilable:
        while h_blk_out > 1 and step_bytes(c_blk, h_blk_out,
                                           min(h_blk_out * sh, h)) > budget:
            h_blk_out = -(-h_blk_out // 2)
        # v7x: guarantee >= 2 parallel grid steps so both TensorCores engage.
        if (nc_pad // c_blk) * pl.cdiv(hout, h_blk_out) < 2:
            h_blk_out = -(-hout // 2)
    h_steps = pl.cdiv(hout, h_blk_out)
    in_rows = h if h_steps == 1 else h_blk_out * sh

    # Grow the lane block while it fits the budget (and keeps >= 2 grid steps).
    while (c_blk * 2 <= nc_pad and nc_pad % (c_blk * 2) == 0
           and step_bytes(c_blk * 2, h_blk_out, in_rows) <= budget
           and (nc_pad // (c_blk * 2)) * h_steps >= 2):
        c_blk *= 2

    # Gate the base / fallback block sizes too: if one step still exceeds the
    # scoped budget (huge padded or overlapping planes), raise the limit as far
    # as this chip allows.
    need = step_bytes(c_blk, h_blk_out, in_rows) + 4 * 1024 * 1024
    if need > vmem_limit:
        vmem_limit = min(vmem_cap - 2 * 1024 * 1024, need)
        # TODO(synk): manual halo-DMA H tiling for planes exceeding even this.

    # ---- wrapper-side layout (target of allow_input_fusion) ----------------
    xt = jnp.transpose(x, (2, 3, 0, 1)).reshape(h, w, nc)
    if nc_pad != nc:
        xt = jnp.pad(xt, ((0, 0), (0, 0), (0, nc_pad - nc)))  # pad value irrelevant

    scratch_shapes = []
    if needs_pad:
        scratch_shapes.append(pltpu.VMEM((h_tot, w_tot, c_blk), x.dtype))
    if sw > 1:
        scratch_shapes.append(pltpu.VMEM((h_blk_out, w_span, c_blk), x.dtype))

    kernel = _make_kernel(kh=kh, kw=kw, sh=sh, sw=sw, dh=dh, dw=dw,
                          ph=ph, pw=pw, needs_pad=needs_pad,
                          w_span=w_span, pad_val=pad_val)

    cost = pl.CostEstimate(
        flops=kh * kw * hout * wout * nc_pad,
        transcendentals=0,
        bytes_accessed=(h * w + hout * wout) * nc_pad * itemsize)

    out = pl.pallas_call(
        kernel,
        out_shape=jax.ShapeDtypeStruct((hout, wout, nc_pad), x.dtype),
        grid=(h_steps, nc_pad // c_blk),
        in_specs=[pl.BlockSpec((in_rows, w, c_blk), lambda hi, ci: (hi, 0, ci))],
        out_specs=pl.BlockSpec((h_blk_out, wout, c_blk),
                               lambda hi, ci: (hi, 0, ci)),
        scratch_shapes=scratch_shapes,
        cost_estimate=cost,
        compiler_params=pltpu.CompilerParams(
            dimension_semantics=("parallel", "parallel"),
            vmem_limit_bytes=int(vmem_limit),
            # Let XLA fuse the NCHW->(H,W,N*C) transpose into the input DMA
            # instead of materializing it in HBM.
            allow_input_fusion=[True]),
    )(xt)

    # (Hout, Wout, N*C[pad]) -> NCHW
    out = out[:, :, :nc].reshape(hout, wout, n, c)
    return jnp.transpose(out, (2, 3, 0, 1))


def _ref_max_pool2d(x, kernel_size, stride=None, padding=0, dilation=1,
                    ceil_mode=False):
    """Independent reference via lax.reduce_window (torch semantics)."""
    kh, kw = _pair(kernel_size)
    sh, sw = _pair(kernel_size if stride is None else stride)
    ph, pw = _pair(padding)
    dh, dw = _pair(dilation)
    _, _, h, w = x.shape
    hout = _pool_out_size(h, kh, sh, ph, dh, ceil_mode)
    wout = _pool_out_size(w, kw, sw, pw, dw, ceil_mode)
    pad_h_hi = max((hout - 1) * sh + dh * (kh - 1) + 1 - h - ph, 0)
    pad_w_hi = max((wout - 1) * sw + dw * (kw - 1) + 1 - w - pw, 0)
    y = jax.lax.reduce_window(
        x, -jnp.inf, jax.lax.max,
        window_dimensions=(1, 1, kh, kw),
        window_strides=(1, 1, sh, sw),
        padding=((0, 0), (0, 0), (ph, pad_h_hi), (pw, pad_w_hi)),
        window_dilation=(1, 1, dh, dw))
    return y[:, :, :hout, :wout]


class _OrgMaxPool2d:
    """Stand-in for torch.nn.MaxPool2d holding the pooling hyper-parameters."""

    def __init__(self, kernel_size, stride=None, padding=0, dilation=1,
                 ceil_mode=False):
        self.kernel_size = kernel_size
        self.stride = kernel_size if stride is None else stride
        self.padding = padding
        self.dilation = dilation
        self.ceil_mode = ceil_mode


class MaxPool2d:
    """Mirror of the Sparsebit MaxPool2d wrapper (forward only, no quantization)."""

    def __init__(self, org_module, config=None):
        self.fwd_kwargs = dict(
            kernel_size=org_module.kernel_size,
            stride=org_module.stride,
            padding=org_module.padding,
            dilation=org_module.dilation,
            ceil_mode=org_module.ceil_mode,
        )

    def __call__(self, x_in):
        return pallas_max_pool2d(x_in, **self.fwd_kwargs)


if __name__ == "__main__":
    key = jax.random.PRNGKey(0)
    x = jax.random.normal(key, (2, 4, 16, 16), dtype=jnp.float32)

    configs = [
        dict(kernel_size=2, stride=2, padding=0, dilation=1, ceil_mode=False),
        dict(kernel_size=3, stride=2, padding=1, dilation=1, ceil_mode=False),
        dict(kernel_size=3, stride=2, padding=0, dilation=1, ceil_mode=True),
    ]
    for cfg in configs:
        mod = MaxPool2d(_OrgMaxPool2d(**cfg))
        y = jax.block_until_ready(mod(x))
        ref = _ref_max_pool2d(x, **cfg)
        assert y.shape == ref.shape and y.dtype == x.dtype, (y.shape, ref.shape, cfg)
        assert bool(jnp.allclose(y, ref)), cfg

    print("KERNEL_OK")
</pallas_src>

<mosaic_0001>
module attributes {stable_mosaic.version = 11 : i64} {
  func.func @kernel(%arg0: i32, %arg1: i32, %arg2: memref<8x16x8xf32, #tpu.memory_space<vmem>>, %arg3: memref<4x8x8xf32, #tpu.memory_space<vmem>>, %arg4: memref<4x15x8xf32, #tpu.memory_space<vmem>>) attributes {dimension_semantics = [#tpu.dimension_semantics<parallel>, #tpu.dimension_semantics<parallel>], iteration_bounds = array<i64: 2, 1>, scalar_prefetch = 0 : i64, scratch_operands = 1 : i64, tpu.core_type = #tpu.core_type<tc>, window_params = [{transform_indices = @transform_0, window_bounds = array<i64: 8, 16, 8>}, {transform_indices = @transform_1, window_bounds = array<i64: 4, 8, 8>}]} {
    %c0 = arith.constant 0 : index
    %c0_0 = arith.constant 0 : index
    %c0_1 = arith.constant 0 : index
    %0 = tpu.strided_load %arg2[%c0, %c0_0, %c0_1] {strides = array<i32: 2, 1, 1>} : memref<8x16x8xf32, #tpu.memory_space<vmem>>, vector<4x15x8xf32>
    %c0_2 = arith.constant 0 : index
    %c1 = arith.constant 1 : index
    %c0_3 = arith.constant 0 : index
    %1 = tpu.strided_load %arg2[%c0_2, %c1, %c0_3] {strides = array<i32: 2, 1, 1>} : memref<8x16x8xf32, #tpu.memory_space<vmem>>, vector<4x15x8xf32>
    %2 = arith.maximumf %0, %1 : vector<4x15x8xf32>
    %c1_4 = arith.constant 1 : index
    %c0_5 = arith.constant 0 : index
    %c0_6 = arith.constant 0 : index
    %3 = tpu.strided_load %arg2[%c1_4, %c0_5, %c0_6] {strides = array<i32: 2, 1, 1>} : memref<8x16x8xf32, #tpu.memory_space<vmem>>, vector<4x15x8xf32>
    %4 = arith.maximumf %2, %3 : vector<4x15x8xf32>
    %c1_7 = arith.constant 1 : index
    %c1_8 = arith.constant 1 : index
    %c0_9 = arith.constant 0 : index
    %5 = tpu.strided_load %arg2[%c1_7, %c1_8, %c0_9] {strides = array<i32: 2, 1, 1>} : memref<8x16x8xf32, #tpu.memory_space<vmem>>, vector<4x15x8xf32>
    %6 = arith.maximumf %4, %5 : vector<4x15x8xf32>
    %c0_10 = arith.constant 0 : index
    %c0_11 = arith.constant 0 : index
    %c0_12 = arith.constant 0 : index
    %7 = vector.load %arg4[%c0_10, %c0_11, %c0_12] : memref<4x15x8xf32, #tpu.memory_space<vmem>>, vector<4x15x8xf32>
    tpu.vector_store %arg4[%c0_10, %c0_11, %c0_12], %6 {strides = array<i32>} : memref<4x15x8xf32, #tpu.memory_space<vmem>>, vector<4x15x8xf32>,
    %c0_13 = arith.constant 0 : index
    %c0_14 = arith.constant 0 : index
    %c0_15 = arith.constant 0 : index
    %8 = tpu.strided_load %arg4[%c0_13, %c0_14, %c0_15] {strides = array<i32: 1, 2, 1>} : memref<4x15x8xf32, #tpu.memory_space<vmem>>, vector<4x8x8xf32>
    %c0_16 = arith.constant 0 : index
    %c0_17 = arith.constant 0 : index
    %c0_18 = arith.constant 0 : index
    %9 = vector.load %arg3[%c0_16, %c0_17, %c0_18] : memref<4x8x8xf32, #tpu.memory_space<vmem>>, vector<4x8x8xf32>
    tpu.vector_store %arg3[%c0_16, %c0_17, %c0_18], %8 {strides = array<i32>} : memref<4x8x8xf32, #tpu.memory_space<vmem>>, vector<4x8x8xf32>,
    return
  }
  func.func @transform_0(%arg0: i32, %arg1: i32) -> (i32, i32, i32) {
    %c0_i32 = arith.constant 0 : i32
    %c0_i32_0 = arith.constant 0 : i32
    return %arg0, %c0_i32, %arg1 : i32, i32, i32
  }
  func.func @transform_1(%arg0: i32, %arg1: i32) -> (i32, i32, i32) {
    %c0_i32 = arith.constant 0 : i32
    %c0_i32_0 = arith.constant 0 : i32
    return %arg0, %c0_i32, %arg1 : i32, i32, i32
  }
}

</mosaic_0001>

<bundles_post_ra>
// kernel: tpu_custom_call.1
= control target key start
LH: loop header
LB: loop body
LE: loop exit
PB: predicated region body
PF: predicated region fallthrough
CT: control target
= control target key end

     0   :  { %6 = vsyncpa [#allocation4], 0  ;;  %s663_s0 = inlined_call_operand.vmem [shape: f32[16,16,8], index: 0, kind: input, shape index: {}]   ;;  %s664_s1 = inlined_call_operand.hbm [shape: f32[8,8,8], index: 1, kind: output, shape index: {}]  }
   0x1   :  { %8 = vsyncpa [#allocation4 + $0x1], 0  ;;  %s499_s6 = smov 0   ;;  %s501_s7 = smov 0  }
   0x2   :  { %s503_s8 = smov 0   ;;  %s505_s9 = smov 0  }
   0x3   :  { %s507_s10 = smov 0   ;;  %s509_s11 = smov 0  }
   0x4 LB: > { %s317_s12 = sadd.s32 4294967295, %s484_s11   ;;  %s318_s13 = sadd.s32 4294967294, %s484_s11   ;;  %s484_s11 = sphi %s509_s11, %s14_s11   ;;  %s480_s10 = sphi %s507_s10, %s671_s10   ;;  %s476_s9 = sphi %s505_s9, %s670_s9   ;;  %s472_s8 = sphi %s503_s8, %s669_s8   ;;  %s468_s7 = sphi %s501_s7, %s668_s7   ;;  %s464_s6 = sphi %s499_s6, %s667_s6  }
   0x5   : > { %s26_s14 = sadd.s32 1, %s480_s10  ;;  %s63_s15 = sadd.s32 1, %s472_s8 }
   0x6   : > { %p28_p0 = scmp.ge.s32.totalorder %s26_s14, 2  ;;  %p73_p1 = scmp.ne.s32.totalorder %s472_s8, %s468_s7 }
   0x7   : > { %p74_p2 = scmp.eq.s32.totalorder %s317_s12, 1  ;;  %p79_p3 = scmp.ne.s32.totalorder %s468_s7, %s464_s6 }
   0x8   : > { %s673_s14 = smov (%p28_p0, %s26_s14), 0  ;;  %p80_p5 = scmp.eq.s32.totalorder %s318_s13, 1 }
   0x9   : > { %p539_p4 = por %p74_p2, %p73_p1  ;;  %s58_s17 = ssub.s32 %s480_s10, %s673_s14 }
   0xa   : > { %p321_p6 = scmp.ge.s32.totalorder %s484_s11, 1  ;;  %p61_p7 = scmp.eq.s32.totalorder %s58_s17, 0 }
   0xb   : > { %p546_p8 = por %p80_p5, %p79_p3  ;;  %p111_p9 = scmp.lt.s32.totalorder %s484_s11, 3 }
   0xc   : > { %s552_s19 = scalar_select %p61_p7, %s472_s8, %s63_s15  }
   0xd   : > { %p112_p10 = pnand %p321_p6, %p111_p9 }
   0xe   : > { %s323_s20 = sshll.u32 (!%p112_p10), %s476_s9, 3  ;;  %vm203_vm0 = vcmask (!%p112_p10), 64512   ;;  %vm205_vm1 = vcmask (!%p112_p10), 63488   ;;  %s132_s25 = sand.u32 (!%p112_p10), 1, %s468_s7  }
   0xf   : > { %115 = sbr.rel (%p112_p10) target bundleno = 65 (0x41), region = 24  ;;  %p136_p11 = scmp.lt.s32.totalorder (!%p112_p10), %s323_s20, 15 }
  0x10   : > { %s322_s26 = sshll.u32 (!%p112_p10), %s132_s25, 5  ;;  %s348_s29 = sshll.u32 (!%p112_p10), %s476_s9, 9 }
  0x11   : > { %s134_s27 = scalar_lea.vmem (!%p112_p10), [#allocation3], %s322_s26  ;;  %s611_s3 = scalar_lea.hbm (!%p112_p10), %s664_s1, %s348_s29 }
  0x12   : > { %s239_s28 = sshll.u32 (!%p112_p10), %s134_s27, 4  ;;  %s617_s4 = scalar_lea.sflag (!%p112_p10), [#allocation4], %s132_s25  ;;  %s606_s28 = int_to_ptr.vmem [resolvable:$true] %s239_s28 }
  0x13   : > { %s406_s5 = scalar_lea.vmem (!%p112_p10), %s606_s28, 512  ;;  %s486_s9 = smov (!%p112_p10), [#allocation3]  }
  0x14   : > { %p407_p12 = scmp.ne.s32.totalorder (!%p112_p10), %s606_s28, %s406_s5  ;;  %s410_s12 = sshll.u32 (!%p112_p10), %s486_s9, 4  ;;  %s411_s12 = int_to_ptr.vmem [resolvable:$false] %s410_s12 }
  0x15   : > { %s412_s13 = scalar_lea.vmem (!%p112_p10), %s411_s12, 1024  ;;  %p413_p1 = scmp.lt.s32.totalorder (!%p112_p10), %s606_s28, %s411_s12 }
  0x16   : > { %s675_s20 = smov (!%p136_p11, %s323_s20), 15  ;;  %p408_p13 = pnand %p407_p12, %p539_p4 }
  0x17   : > { %s347_s21 = sshll.u32 %s675_s20, 4  ;;  %p414_p2 = scmp.lt.s32.totalorder %s412_s13, %s406_s5 }
  0x18   : > { %s558_s24 = scalar_lea.vmem %s663_s0, %s347_s21  ;;  %p409_p0 = pneg %p408_p13 }
  0x19   : > { %v146_v0 = vld [vmem:[%s558_s24] sm:$0xff]  ;;  %v326_v2 = vld [vmem:[%s558_s24 + $0x10] sm:$0xff]  ;;  %v147_v4 = vld [vmem:[%s558_s24 + $0x8] sm:$0x7f]  ;;  %p415_p3 = por %p414_p2, %p413_p1 }
  0x1a   : > { %v154_v1 = vld [vmem:[%s558_s24 + $0x1] sm:$0xff]  ;;  %v155_v5 = vld [vmem:[%s558_s24 + $0x9] sm:$0x7f]  ;;  %v334_v6 = vld [vmem:[%s558_s24 + $0x11] sm:$0xff] }
  0x1b   : > { %v162_v3 = vmax.f32 %v146_v0, %v154_v1  ;;  %v163_v7 = vmax.f32 %v147_v4, %v155_v5  ;;  %v327_v8 = vld [vmem:[%s558_s24 + $0x18] sm:$0x7f]  ;;  %v148_v9 = vld [vmem:[%s558_s24 + $0x20] sm:$0xff]  ;;  %v328_v13 = vld [vmem:[%s558_s24 + $0x30] sm:$0xff]  ;;  %p416_p5 = pnand %p415_p3, %p409_p0 }
  0x1c   : > { %v335_v11 = vld [vmem:[%s558_s24 + $0x19] sm:$0x7f]  ;;  %v156_v12 = vld [vmem:[%s558_s24 + $0x21] sm:$0xff]  ;;  %v157_v17 = vld [vmem:[%s558_s24 + $0x29] sm:$0x7f] }
  0x1d   : > { %v179_v10 = vmax.f32 %v162_v3, %v326_v2  ;;  %v180_v14 = vmax.f32 %v163_v7, %v327_v8  ;;  %v164_v15 = vmax.f32 %v148_v9, %v156_v12  ;;  %v149_v16 = vld [vmem:[%s558_s24 + $0x28] sm:$0x7f]  ;;  %v329_v18 = vld [vmem:[%s558_s24 + $0x38] sm:$0x7f]  ;;  %v150_v22 = vld [vmem:[%s558_s24 + $0x40] sm:$0xff] }
  0x1e   : > { %v336_v20 = vld [vmem:[%s558_s24 + $0x31] sm:$0xff]  ;;  %v165_v21 = vmax.f32 %v149_v16, %v157_v17  ;;  %v158_v23 = vld [vmem:[%s558_s24 + $0x41] sm:$0xff]  ;;  %v337_v26 = vld [vmem:[%s558_s24 + $0x39] sm:$0x7f] }
  0x1f   : > { %v195_v19 = vmax.f32 %v179_v10, %v334_v6  ;;  %v196_v24 = vmax.f32 %v180_v14, %v335_v11  ;;  %v181_v25 = vmax.f32 %v164_v15, %v328_v13  ;;  %v166_v27 = vmax.f32 %v150_v22, %v158_v23  ;;  %v330_v28 = vld [vmem:[%s558_s24 + $0x50] sm:$0xff]  ;;  %v151_v29 = vld [vmem:[%s558_s24 + $0x48] sm:$0x7f]  ;;  %v331_v33 = vld [vmem:[%s558_s24 + $0x58] sm:$0x7f] }
  0x20   : > { %v182_v30 = vmax.f32 %v165_v21, %v329_v18  ;;  %v338_v31 = vld [vmem:[%s558_s24 + $0x51] sm:$0xff]  ;;  %v159_v32 = vld [vmem:[%s558_s24 + $0x49] sm:$0x7f]  ;;  %v152_v37 = vld [vmem:[%s558_s24 + $0x60] sm:$0xff] }
  0x21   : > { %204 = vst.msk [vmem:[#allocation2] sm:$0xff] %vm203_vm0, %v195_v19  ;;  %v197_v34 = vmax.f32 %v181_v25, %v336_v20  ;;  %v183_v35 = vmax.f32 %v166_v27, %v330_v28  ;;  %v167_v36 = vmax.f32 %v151_v29, %v159_v32  ;;  %v160_v38 = vld [vmem:[%s558_s24 + $0x61] sm:$0xff]  ;;  %v332_v39 = vld [vmem:[%s558_s24 + $0x70] sm:$0xff]  ;;  %v339_v41 = vld [vmem:[%s558_s24 + $0x59] sm:$0x7f] }
  0x22   : > { %206 = vst.msk [vmem:[#allocation2 + $0x8] sm:$0x7f] %vm205_vm1, %v196_v24  ;;  %v198_v40 = vmax.f32 %v182_v30, %v337_v26  ;;  %v168_v42 = vmax.f32 %v152_v37, %v160_v38  ;;  %v153_v43 = vld [vmem:[%s558_s24 + $0x68] sm:$0x7f]  ;;  %v340_v47 = vld [vmem:[%s558_s24 + $0x71] sm:$0xff] }
  0x23   : > { %v161_v44 = vld [vmem:[%s558_s24 + $0x69] sm:$0x7f]  ;;  %207 = vst.msk [vmem:[#allocation2 + $0x10] sm:$0xff] %vm203_vm0, %v197_v34  ;;  %v199_v45 = vmax.f32 %v183_v35, %v338_v31  ;;  %v184_v46 = vmax.f32 %v167_v36, %v331_v33  ;;  %v333_v49 = vld [vmem:[%s558_s24 + $0x78] sm:$0x7f] }
  0x24   : > { %v169_v48 = vmax.f32 %v153_v43, %v161_v44  ;;  %208 = vst.msk [vmem:[#allocation2 + $0x18] sm:$0x7f] %vm205_vm1, %v198_v40  ;;  %v185_v50 = vmax.f32 %v168_v42, %v332_v39  ;;  %v341_v51 = vld [vmem:[%s558_s24 + $0x79] sm:$0x7f] }
  0x25   : > { %209 = vst.msk [vmem:[#allocation2 + $0x20] sm:$0xff] %vm203_vm0, %v199_v45  ;;  %v200_v52 = vmax.f32 %v184_v46, %v339_v41 }
  0x26   : > { %v186_v53 = vmax.f32 %v169_v48, %v333_v49  ;;  %v201_v54 = vmax.f32 %v185_v50, %v340_v47 }
  0x27   : > { %210 = vst.msk [vmem:[#allocation2 + $0x28] sm:$0x7f] %vm205_vm1, %v200_v52 }
  0x28   : > { %v202_v55 = vmax.f32 %v186_v53, %v341_v51  ;;  %211 = vst.msk [vmem:[#allocation2 + $0x30] sm:$0xff] %vm203_vm0, %v201_v54 }
  0x29   : > { %v213_v56 = vld [vmem:[#allocation2] ss:$2 sm:$0xff] }
  0x2a   : > { %212 = vst.msk [vmem:[#allocation2 + $0x38] sm:$0x7f] %vm205_vm1, %v202_v55 }
  0x2b   : > { %220 = vst.msk [vmem:[%s134_s27] sm:$0xff] %vm203_vm0, %v213_v56  ;;  %v215_v57 = vld [vmem:[#allocation2 + $0x10] ss:$2 sm:$0xff] }
  0x2c   : > { %221 = vst.msk [vmem:[%s134_s27 + $0x8] sm:$0xff] %vm203_vm0, %v215_v57 }
  0x2e   : > { %v217_v58 = vld [vmem:[#allocation2 + $0x20] ss:$2 sm:$0xff] }
  0x2f   : > { %222 = vst.msk [vmem:[%s134_s27 + $0x10] sm:$0xff] %vm203_vm0, %v217_v58 }
  0x31   : > { %v219_v59 = vld [vmem:[#allocation2 + $0x30] ss:$2 sm:$0xff] }
  0x32   : > { %223 = vst.msk [vmem:[%s134_s27 + $0x18] sm:$0xff] %vm203_vm0, %v219_v59 }
  0x33   : > { %419 = shalt.err (!%p416_p5)
}
  0x34   : > { %s420_s15 = scalar_lea.hbm %s611_s3, 512  ;;  %s424_s21 = scalar_lea.hbm %s664_s1, 1024 }
  0x35   : > { %p421_p6 = scmp.ne.s32.totalorder %s611_s3, %s420_s15  ;;  %p425_p10 = scmp.lt.u32.totalorder %s611_s3, %s664_s1 }
  0x36   : > { %p426_p11 = scmp.lt.u32.totalorder %s424_s21, %s420_s15  ;;  %p428_p13 = scmp.lt.u32.totalorder %s420_s15, %s611_s3 }
  0x37   : > { %p422_p7 = pnand %p421_p6, %p539_p4 }
  0x38   : > { %p427_p12 = por %p426_p11, %p425_p10 }
  0x39   : > { %p423_p9 = pneg %p422_p7 }
  0x3a   : > { %p429_p0 = por %p428_p13, %p427_p12 }
  0x3c   : > { %p430_p1 = pnand %p429_p0, %p423_p9 }
  0x3e   : > { %433 = shalt.err (!%p430_p1)
}
  0x3f   : > { %s487_s24 = smov 128   ;;  %s488_s25 = smov 8  }
  0x40   : > { %349 = dma.vmem_to_hbm [thread:$0]  (%p539_p4), %s606_s28, 512, %s611_s3, %s617_s4, %s487_s24, %s487_s24, %s488_s25  }
  0x41 PF: > { %p355_p2 = scmp.ge.s32.totalorder %s484_s11, 2  ;;  %s254_s26 = sand.u32 1, %s464_s6  }
  0x42   : > { %s255_s27 = scalar_lea.sflag [#allocation4], %s254_s26 }
  0x43   : > { %p352_p3 = pnand %p355_p2, %p546_p8 }
  0x45   : > { %459 = dma.done.wait (!%p352_p3), %s255_s27, 512  }
  0x46   : > { %461 = vsyncadd (!%p352_p3), %s255_s27, 4294966784  ;;  %s14_s11 = sadd.s32 1, %s484_s11   ;;  %s667_s6 = smov %s468_s7 }
  0x47   : > { %p11_p5 = scmp.ge.s32.totalorder %s14_s11, 4   ;;  %s668_s7 = smov %s472_s8 }
  0x48   : > { %s669_s8 = smov %s552_s19  ;;  %s670_s9 = smov %s480_s10 }
  0x49   : > { %s671_s10 = smov %s673_s14  ;;  %13 = sbr.rel (!%p11_p5) target bundleno = 4 (0x4), region = 63 }
  0x50   :  { %260 = vsyncpa [#allocation4], 1 }
  0x51   :  { %262 = vsyncpa [#allocation4 + $0x1], 1 }

</bundles_post_ra>
